<compile_context>
chip_gen: v7x
topology: tpu7x:2x2x1
jax: 0.10.0
libtpu: 0.0.40
codegen_flags: <defaults>
</compile_context>

<pallas_src>
import jax
import jax.numpy as jnp
from jax import lax
from jax.experimental import pallas as pl
from jax.experimental.pallas import tpu as pltpu

_LANE = 128
_VMEM_TILE_BUDGET = 16 * 1024 * 1024  # bytes spent on batch-tile-scaled data


def _critic_kernel(x_ref, w1_ref, b1_ref, w2_ref, b2_ref, w3_ref, b3_ref, o_ref):
    # x_ref:  (TILE_B, S)   native layout; only per-step HBM stream
    # w1_ref: (H, S)        b1_ref: (H, 1)
    # w2_ref: (2H, H)       b2_ref: (2H, 1)
    # w3_ref: (2H, 1)       b3_ref: (1, 1) scalar in SMEM
    # o_ref:  (1, TILE_B)   batch on lanes -> unmasked lane-dense store
    x = x_ref[...]

    # Layer 1: contract the shared last (feature) dim -> (H, TILE_B).
    # Same contraction pattern as q @ k.T; MXU matmul with f32 accumulation.
    # The tiny (TILE_B, S) -> (S, TILE_B) reorientation rides the XLU slot.
    h1 = lax.dot_general(w1_ref[...], x, (((1,), (1,)), ((), ())),
                         preferred_element_type=jnp.float32)
    h1 = jnp.maximum(h1 + b1_ref[...], 0.0)          # f32 bias + ReLU on VPU

    # Layer 2: (2H, H) @ (H, TILE_B) -> (2H, TILE_B).
    h2 = jnp.dot(w2_ref[...], h1.astype(w2_ref.dtype),
                 preferred_element_type=jnp.float32)
    h2 = jnp.maximum(h2 + b2_ref[...], 0.0)

    # Layer 3 (out_features == 1): VPU multiply + sublane reduce instead of a
    # 1-wide MXU matmul; result (1, TILE_B) stays lane-dense for the store.
    out = jnp.sum(h2 * w3_ref[...], axis=0, keepdims=True) + b3_ref[0, 0]
    o_ref[...] = out.astype(o_ref.dtype)


def _round_up(n, m):
    return ((n + m - 1) // m) * m


def prepare_params(params, matmul_dtype=jnp.float32):
    """One-time conversion to kernel-ready layout/dtypes.

    For serving, call this once and pass the result via `prepared=` so the
    weight casts are not re-run (and re-read from HBM) on every forward.
    PyTorch layout is assumed: W* is (out, in), b* is (out,).
    """
    W1, b1 = params["W1"], params["b1"]
    W2, b2 = params["W2"], params["b2"]
    W3, b3 = params["W3"], params["b3"]
    H = W1.shape[0]
    H2 = W2.shape[0]
    return dict(
        w1=W1.astype(matmul_dtype),                      # (H, S)   MXU operand
        b1=b1.reshape(H, 1).astype(jnp.float32),         # (H, 1)   f32 VPU
        w2=W2.astype(matmul_dtype),                      # (2H, H)  MXU operand
        b2=b2.reshape(H2, 1).astype(jnp.float32),        # (2H, 1)
        w3=W3.reshape(H2, 1).astype(jnp.float32),        # (2H, 1)  VPU reduce
        b3=b3.reshape(1, 1).astype(jnp.float32),         # (1, 1)   SMEM scalar
    )


def _choose_tile_b(B, requested, S, H, H2, x_bytes, w_bytes):
    """Pick the batch tile: big enough to amortize grid-step overhead, small
    enough to fit VMEM, and leaving >= 4 grid steps when the batch affords it
    (2 TensorCores on v7x x >= 2 steps each for pipeline overlap)."""
    Bp = _round_up(B, _LANE)
    # Bytes of VMEM per batch lane: double-buffered x block, double-buffered
    # (1, tile) output row, f32 h1 (+ matmul-dtype copy), f32 h2 (+ temp).
    per_lane = (2 * S * x_bytes + 2 * 4
                + H * 4 + H * w_bytes
                + 2 * H2 * 4)
    # Resident (constant index map) weights/biases, double-buffered by default.
    resident = 2 * (H * S + H2 * H) * w_bytes + 2 * (H + 2 * H2 + 1) * 4
    budget = max(_VMEM_TILE_BUDGET - resident, _LANE * per_lane)
    vmem_ceiling = max((budget // per_lane) // _LANE * _LANE, _LANE)

    tile = _round_up(max(int(requested), _LANE), _LANE)
    tile = min(tile, vmem_ceiling)
    tile = min(tile, max(_round_up(pl.cdiv(Bp, 4), _LANE), _LANE))
    tile = min(tile, Bp)
    return tile, resident, per_lane


def critic_reference(x, p):
    h1 = jnp.maximum(x @ p["W1"].T + p["b1"], 0.0)
    h2 = jnp.maximum(h1 @ p["W2"].T + p["b2"], 0.0)
    return h2 @ p["W3"].T + p["b3"]


def critic_forward(x, params, *, tile_b=4096, matmul_dtype=None, prepared=None,
                   small_batch_threshold=512, force_pallas=False):
    """x: (B, state_length).  params: PyTorch-layout weights (see prepare_params).

    matmul_dtype: jnp.bfloat16 recommended on v6e/v7x (f32 accumulation kept,
    biases / ReLU / final reduction stay f32).  Default: x.dtype (exact path).
    """
    B, S = x.shape
    out_dtype = x.dtype

    # Small-batch fast path: plain XLA fusion wins at these sizes on every
    # generation; below one 128-lane tile Pallas is not attempted at all.
    if B < _LANE or (B < small_batch_threshold and not force_pallas):
        return critic_reference(x, params).astype(out_dtype)

    if matmul_dtype is None:
        matmul_dtype = x.dtype
    if prepared is None:
        prepared = prepare_params(params, matmul_dtype)
    w1, b1 = prepared["w1"], prepared["b1"]
    w2, b2 = prepared["w2"], prepared["b2"]
    w3, b3 = prepared["w3"], prepared["b3"]
    H, H2 = w1.shape[0], w2.shape[0]

    # DMA x in the matmul dtype (halves the only per-step HBM stream on the
    # bf16 path).  Ideally callers already hold x in this dtype.
    if x.dtype != matmul_dtype:
        x = x.astype(matmul_dtype)

    tile_b, resident_bytes, per_lane_bytes = _choose_tile_b(
        B, tile_b, S, H, H2, x.dtype.itemsize, w1.dtype.itemsize)
    num_tiles = pl.cdiv(B, tile_b)

    # Explicit scoped-VMEM request: 2x the estimate, floored at 32 MiB (safe
    # on v5e/v6e/v7x) and capped below v7x's 64 MiB physical VMEM.
    vmem_limit = int(min(
        max(2 * (resident_bytes + per_lane_bytes * tile_b), 32 * 1024 * 1024),
        48 * 1024 * 1024))

    out = pl.pallas_call(
        _critic_kernel,
        out_shape=jax.ShapeDtypeStruct((1, B), out_dtype),
        grid=(num_tiles,),
        in_specs=[
            pl.BlockSpec((tile_b, S), lambda i: (i, 0)),        # x tile (streamed)
            pl.BlockSpec((H, S), lambda i: (0, 0)),             # W1 (VMEM-resident)
            pl.BlockSpec((H, 1), lambda i: (0, 0)),             # b1
            pl.BlockSpec((H2, H), lambda i: (0, 0)),            # W2
            pl.BlockSpec((H2, 1), lambda i: (0, 0)),            # b2
            pl.BlockSpec((H2, 1), lambda i: (0, 0)),            # W3 row as a column
            pl.BlockSpec(memory_space=pltpu.MemorySpace.SMEM),  # b3 scalar
        ],
        out_specs=pl.BlockSpec((1, tile_b), lambda i: (0, i)),
        compiler_params=pltpu.CompilerParams(
            dimension_semantics=("parallel",),
            vmem_limit_bytes=vmem_limit),
    )(x, w1, b1, w2, b2, w3, b3)

    # (1, B) lane-dense slab -> (B, 1) column, matching the PyTorch module.
    return out.reshape(B, 1)


def init_params(key, state_length, hidden, dtype=jnp.float32):
    """Deterministic init matching nn.Linear (weights stored as (out, in))."""
    ks = jax.random.split(key, 6)

    def lin(kw, kb, fan_in, fan_out):
        bound = 1.0 / jnp.sqrt(jnp.float32(fan_in))
        W = jax.random.uniform(kw, (fan_out, fan_in), dtype, -bound, bound)
        b = jax.random.uniform(kb, (fan_out,), dtype, -bound, bound)
        return W, b

    W1, b1 = lin(ks[0], ks[1], state_length, hidden)
    W2, b2 = lin(ks[2], ks[3], hidden, 2 * hidden)
    W3, b3 = lin(ks[4], ks[5], 2 * hidden, 1)
    return {"W1": W1, "b1": b1, "W2": W2, "b2": b2, "W3": W3, "b3": b3}


if __name__ == "__main__":
    key = jax.random.PRNGKey(0)
    k_xs, k_x, k_p = jax.random.split(key, 3)

    state_length, hidden = 16, 32
    params = init_params(k_p, state_length, hidden)

    # 1) Tiny batch: dispatches to the XLA fast path (Pallas padding + launch
    #    overhead loses at this size on every TPU generation).
    x_small = jax.random.normal(k_xs, (8, state_length), jnp.float32)
    out_small = jax.block_until_ready(critic_forward(x_small, params))
    assert out_small.shape == (8, 1), out_small.shape
    assert jnp.allclose(out_small, critic_reference(x_small, params),
                        atol=1e-5, rtol=1e-5)

    # 2) Pallas path: batch large enough for the kernel; 1000 is not a
    #    multiple of the 128-lane tile, exercising the ragged last block.
    batch = 1000
    x = jax.random.normal(k_x, (batch, state_length), jnp.float32)
    ref = critic_reference(x, params)

    out = jax.block_until_ready(critic_forward(x, params))      # f32 MXU path
    assert out.shape == (batch, 1), out.shape
    assert jnp.allclose(out, ref, atol=1e-3, rtol=1e-3), \
        float(jnp.max(jnp.abs(out - ref)))

    # 3) bf16-matmul / f32-accumulate path (recommended on v6e/v7x); weights
    #    converted once via prepare_params and reused.
    prepared_bf16 = prepare_params(params, jnp.bfloat16)
    out_bf16 = jax.block_until_ready(
        critic_forward(x, params, matmul_dtype=jnp.bfloat16,
                       prepared=prepared_bf16))
    assert out_bf16.shape == (batch, 1), out_bf16.shape
    assert jnp.allclose(out_bf16, ref, atol=5e-2, rtol=5e-2), \
        float(jnp.max(jnp.abs(out_bf16 - ref)))

    print("KERNEL_OK")
</pallas_src>

<mosaic_0001>
module attributes {stable_mosaic.version = 11 : i64} {
  func.func @_critic_kernel(%arg0: i32, %arg1: memref<256x16xf32, #tpu.memory_space<vmem>>, %arg2: memref<32x16xf32, #tpu.memory_space<vmem>>, %arg3: memref<32x1xf32, #tpu.memory_space<vmem>>, %arg4: memref<64x32xf32, #tpu.memory_space<vmem>>, %arg5: memref<64x1xf32, #tpu.memory_space<vmem>>, %arg6: memref<64x1xf32, #tpu.memory_space<vmem>>, %arg7: memref<1x1xf32, #tpu.memory_space<smem>>, %arg8: memref<1x256xf32, #tpu.memory_space<vmem>>) attributes {dimension_semantics = [#tpu.dimension_semantics<parallel>], iteration_bounds = array<i64: 4>, scalar_prefetch = 0 : i64, scratch_operands = 0 : i64, tpu.core_type = #tpu.core_type<tc>, window_params = [{transform_indices = @transform_0, window_bounds = array<i64: 256, 16>}, {pipeline_mode = #tpu.pipeline_mode<synchronous>, transform_indices = @transform_1, window_bounds = array<i64: 32, 16>}, {pipeline_mode = #tpu.pipeline_mode<synchronous>, transform_indices = @transform_2, window_bounds = array<i64: 32, 1>}, {pipeline_mode = #tpu.pipeline_mode<synchronous>, transform_indices = @transform_3, window_bounds = array<i64: 64, 32>}, {pipeline_mode = #tpu.pipeline_mode<synchronous>, transform_indices = @transform_4, window_bounds = array<i64: 64, 1>}, {pipeline_mode = #tpu.pipeline_mode<synchronous>, transform_indices = @transform_5, window_bounds = array<i64: 64, 1>}, {transform_indices = @transform_6, window_bounds = array<i64: 1, 1>}, {transform_indices = @transform_7, window_bounds = array<i64: 1, 256>}]} {
    %c0 = arith.constant 0 : index
    %c0_0 = arith.constant 0 : index
    %0 = vector.load %arg1[%c0, %c0_0] : memref<256x16xf32, #tpu.memory_space<vmem>>, vector<256x16xf32>
    %c0_1 = arith.constant 0 : index
    %c0_2 = arith.constant 0 : index
    %1 = vector.load %arg2[%c0_1, %c0_2] : memref<32x16xf32, #tpu.memory_space<vmem>>, vector<32x16xf32>
    %cst = arith.constant dense<0.000000e+00> : vector<32x256xf32>
    %2 = tpu.matmul %1, %0, %cst {dimension_numbers = #tpu.dot_dimension_numbers<[1], [1], [0], [0], [0, 0, 1, 0], [], []>} : vector<32x16xf32>, vector<256x16xf32>, vector<32x256xf32> -> vector<32x256xf32>
    %c0_3 = arith.constant 0 : index
    %c0_4 = arith.constant 0 : index
    %3 = vector.load %arg3[%c0_3, %c0_4] : memref<32x1xf32, #tpu.memory_space<vmem>>, vector<32x1xf32>
    %4 = vector.broadcast %3 : vector<32x1xf32> to vector<32x256xf32>
    %5 = arith.addf %2, %4 : vector<32x256xf32>
    %cst_5 = arith.constant 0.000000e+00 : f32
    %6 = vector.broadcast %cst_5 : f32 to vector<32x256xf32>
    %7 = arith.maximumf %5, %6 : vector<32x256xf32>
    %c0_6 = arith.constant 0 : index
    %c0_7 = arith.constant 0 : index
    %8 = vector.load %arg4[%c0_6, %c0_7] : memref<64x32xf32, #tpu.memory_space<vmem>>, vector<64x32xf32>
    %cst_8 = arith.constant dense<0.000000e+00> : vector<64x256xf32>
    %9 = tpu.matmul %8, %7, %cst_8 {dimension_numbers = #tpu.dot_dimension_numbers<[1], [0], [0], [1], [0, 0, 1, 1], [], []>} : vector<64x32xf32>, vector<32x256xf32>, vector<64x256xf32> -> vector<64x256xf32>
    %c0_9 = arith.constant 0 : index
    %c0_10 = arith.constant 0 : index
    %10 = vector.load %arg5[%c0_9, %c0_10] : memref<64x1xf32, #tpu.memory_space<vmem>>, vector<64x1xf32>
    %11 = vector.broadcast %10 : vector<64x1xf32> to vector<64x256xf32>
    %12 = arith.addf %9, %11 : vector<64x256xf32>
    %cst_11 = arith.constant 0.000000e+00 : f32
    %13 = vector.broadcast %cst_11 : f32 to vector<64x256xf32>
    %14 = arith.maximumf %12, %13 : vector<64x256xf32>
    %c0_12 = arith.constant 0 : index
    %c0_13 = arith.constant 0 : index
    %15 = vector.load %arg6[%c0_12, %c0_13] : memref<64x1xf32, #tpu.memory_space<vmem>>, vector<64x1xf32>
    %16 = vector.broadcast %15 : vector<64x1xf32> to vector<64x256xf32>
    %17 = arith.mulf %14, %16 : vector<64x256xf32>
    %cst_14 = arith.constant dense<0.000000e+00> : vector<256xf32>
    %18 = vector.multi_reduction <add>, %17, %cst_14 [0] : vector<64x256xf32> to vector<256xf32>
    %19 = vector.shape_cast %18 : vector<256xf32> to vector<1x256xf32>
    %c0_15 = arith.constant 0 : index
    %c0_16 = arith.constant 0 : index
    %20 = memref.load %arg7[%c0_15, %c0_16] : memref<1x1xf32, #tpu.memory_space<smem>>
    %21 = vector.broadcast %20 : f32 to vector<1x256xf32>
    %22 = arith.addf %19, %21 : vector<1x256xf32>
    %c0_17 = arith.constant 0 : index
    %c0_18 = arith.constant 0 : index
    %23 = vector.load %arg8[%c0_17, %c0_18] : memref<1x256xf32, #tpu.memory_space<vmem>>, vector<1x256xf32>
    tpu.vector_store %arg8[%c0_17, %c0_18], %22 {strides = array<i32>} : memref<1x256xf32, #tpu.memory_space<vmem>>, vector<1x256xf32>,
    return
  }
  func.func @transform_0(%arg0: i32) -> (i32, i32) {
    %c0_i32 = arith.constant 0 : i32
    %c0_i32_0 = arith.constant 0 : i32
    return %arg0, %c0_i32 : i32, i32
  }
  func.func @transform_1(%arg0: i32) -> (i32, i32) {
    %c0_i32 = arith.constant 0 : i32
    %c0_i32_0 = arith.constant 0 : i32
    %c0_i32_1 = arith.constant 0 : i32
    return %c0_i32, %c0_i32_0 : i32, i32
  }
  func.func @transform_2(%arg0: i32) -> (i32, i32) {
    %c0_i32 = arith.constant 0 : i32
    %c0_i32_0 = arith.constant 0 : i32
    %c0_i32_1 = arith.constant 0 : i32
    return %c0_i32, %c0_i32_0 : i32, i32
  }
  func.func @transform_3(%arg0: i32) -> (i32, i32) {
    %c0_i32 = arith.constant 0 : i32
    %c0_i32_0 = arith.constant 0 : i32
    %c0_i32_1 = arith.constant 0 : i32
    return %c0_i32, %c0_i32_0 : i32, i32
  }
  func.func @transform_4(%arg0: i32) -> (i32, i32) {
    %c0_i32 = arith.constant 0 : i32
    %c0_i32_0 = arith.constant 0 : i32
    %c0_i32_1 = arith.constant 0 : i32
    return %c0_i32, %c0_i32_0 : i32, i32
  }
  func.func @transform_5(%arg0: i32) -> (i32, i32) {
    %c0_i32 = arith.constant 0 : i32
    %c0_i32_0 = arith.constant 0 : i32
    %c0_i32_1 = arith.constant 0 : i32
    return %c0_i32, %c0_i32_0 : i32, i32
  }
  func.func @transform_6(%arg0: i32) -> (i32, i32) {
    %c0_i32 = arith.constant 0 : i32
    %c0_i32_0 = arith.constant 0 : i32
    %c0_i32_1 = arith.constant 0 : i32
    return %c0_i32, %c0_i32_0 : i32, i32
  }
  func.func @transform_7(%arg0: i32) -> (i32, i32) {
    %c0_i32 = arith.constant 0 : i32
    %c0_i32_0 = arith.constant 0 : i32
    return %c0_i32, %arg0 : i32, i32
  }
}

</mosaic_0001>

<bundles_post_ra>
// kernel: tpu_custom_call.1
= control target key start
LH: loop header
LB: loop body
LE: loop exit
PB: predicated region body
PF: predicated region fallthrough
CT: control target
= control target key end

     0   :  { %s1563_s0 = inlined_call_operand.vmem [shape: f32[1000,16], index: 0, kind: input, shape index: {}]   ;;  %s1564_s1 = inlined_call_operand.vmem [shape: f32[32,16], index: 1, kind: input, shape index: {}]   ;;  %s1565_s2 = inlined_call_operand.vmem [shape: f32[32,1], index: 2, kind: input, shape index: {}]   ;;  %s1566_s3 = inlined_call_operand.vmem [shape: f32[64,32], index: 3, kind: input, shape index: {}]   ;;  %s1567_s4 = inlined_call_operand.vmem [shape: f32[64,1], index: 4, kind: input, shape index: {}]   ;;  %s1568_s5 = inlined_call_operand.vmem [shape: f32[64,1], index: 5, kind: input, shape index: {}]   ;;  %s1569_s6 = inlined_call_operand.<no memory space> [shape: f32[1,1], index: 6, kind: input, shape index: {}]   ;;  %s1570_s7 = inlined_call_operand.hbm [shape: f32[1,1000], index: 7, kind: output, shape index: {}]  }
   0x1   :  { %12 = sst [smem:[#allocation2]] %s1569_s6 }
   0x2   :  { %13 = vsyncpa [#allocation4], 0 }
   0x3   :  { %15 = vsyncpa [#allocation4 + $0x1], 0  ;;  %s1276_s26 = smov 0   ;;  %s1278_s27 = smov 0  }
   0x4   :  { %s1280_s28 = smov 0   ;;  %s1282_s29 = smov 0  }
   0x5 LB: > { %s967_s6 = sadd.s32 4294967295, %s1227_s29   ;;  %s968_s30 = sadd.s32 4294967294, %s1227_s29   ;;  %s1227_s29 = sphi %s1282_s29, %s1578_s29   ;;  %s1223_s28 = sphi %s1280_s28, %s1577_s28   ;;  %s1219_s27 = sphi %s1278_s27, %s1576_s27   ;;  %s1215_s26 = sphi %s1276_s26, %s1575_s26  }
   0x6   : > { %s1299_s8 = sadd.s32 1, %s1227_s29   ;;  %s180_s9 = sadd.s32 1, %s1223_s28 }
   0x7   : > { %s177_s10 = ssub.s32 %s1227_s29, %s1299_s8  ;;  %p190_p0 = scmp.ne.s32.totalorder %s1223_s28, %s1219_s27 }
   0x8   : > { %p178_p1 = scmp.eq.s32.totalorder %s177_s10, 0  ;;  %p191_p2 = scmp.eq.s32.totalorder %s967_s6, 3 }
   0x9   : > { %p196_p3 = scmp.ne.s32.totalorder %s1219_s27, %s1215_s26  ;;  %p197_p4 = scmp.eq.s32.totalorder %s968_s30, 3 }
   0xa   : > { %s1309_s11 = scalar_select %p178_p1, %s1223_s28, %s180_s9  }
   0xb   : > { %p1311_p5 = por %p191_p2, %p190_p0  ;;  %p1315_p6 = por %p197_p4, %p196_p3 }
   0xc   : > { %p971_p7 = scmp.ge.s32.totalorder %s1227_s29, 1  ;;  %p250_p8 = scmp.lt.s32.totalorder %s1227_s29, 5 }
   0xe   : > { %p251_p9 = pnand %p971_p7, %p250_p8 }
   0xf   : > { %s1321_s14 = sshll.u32 (!%p251_p9), %s967_s6, 5  ;;  %vm361_vm0 = vcmask (!%p251_p9), 130048   ;;  %v1326_v0 = vld [vmem:[%s1564_s1] sm:$0xff] (!%p251_p9)  ;;  %v1229_v1 = vmov (!%p251_p9), 0   ;;  %v339_v3 = vld [vmem:[%s1565_s2 + $0x10] sm:$0xff] (!%p251_p9)  ;;  %v338_v4 = vld [vmem:[%s1565_s2 + $0x8] sm:$0xff] (!%p251_p9) }
  0x10   : > { %254 = sbr.rel (%p251_p9) target bundleno = 612 (0x264), region = 48  ;;  %p291_p10 = scmp.lt.s32.totalorder (!%p251_p9), %s1321_s14, 124  ;;  %1057 = vmatprep.mubr.msk.f32.mxu0 (!%p251_p9), %vm361_vm0, %v1326_v0  ;;  %1163 = vset.pattern.permute.xlu0 (!%p251_p9), %v1229_v1  ;;  %v337_v2 = vld [vmem:[%s1565_s2] sm:$0xff] (!%p251_p9)  ;;  %v340_v5 = vld [vmem:[%s1565_s2 + $0x18] sm:$0xff] (!%p251_p9)  ;;  %vm1351_vm1 = vmpackc.low (!%p251_p9), %vm361_vm0, %vm361_vm0  ;;  %vm623_vm2 = vcmask (!%p251_p9), 261120  }
  0x11   : > { %343 = vperm.xlu0 (!%p251_p9), %1163, %v337_v2   ;;  %1164 = vset.pattern.permute.xlu1 (!%p251_p9), %v1229_v1  ;;  %v575_v7 = vld [vmem:[%s1567_s4] sm:$0xff] (!%p251_p9)  ;;  %v576_v8 = vld [vmem:[%s1567_s4 + $0x8] sm:$0xff] (!%p251_p9)  ;;  %v577_v18 = vld [vmem:[%s1567_s4 + $0x10] sm:$0xff] (!%p251_p9)  ;;  %s867_s25 = sld [smem:[#allocation2]] (!%p251_p9)  ;;  %s1521_s18 = scalar_lea.hbm (!%p251_p9), %s1570_s7, %s1321_s14 }
  0x12   : > { %353 = vperm.xlu1 (!%p251_p9), %1164, %v339_v3   ;;  %v578_v21 = vld [vmem:[%s1567_s4 + $0x18] sm:$0xff] (!%p251_p9)  ;;  %v777_v25 = vld [vmem:[%s1568_s5] sm:$0xff] (!%p251_p9)  ;;  %v778_v27 = vld [vmem:[%s1568_s5 + $0x8] sm:$0xff] (!%p251_p9) }
  0x13   : > { %v579_v28 = vld [vmem:[%s1567_s4 + $0x20] sm:$0xff] (!%p251_p9)  ;;  %v779_v31 = vld [vmem:[%s1568_s5 + $0x10] sm:$0xff] (!%p251_p9)  ;;  %v580_v35 = vld [vmem:[%s1567_s4 + $0x28] sm:$0xff] (!%p251_p9) }
  0x14   : > { %v780_v37 = vld [vmem:[%s1568_s5 + $0x18] sm:$0xff] (!%p251_p9)  ;;  %v581_v38 = vld [vmem:[%s1567_s4 + $0x30] sm:$0xff] (!%p251_p9)  ;;  %v781_v41 = vld [vmem:[%s1568_s5 + $0x20] sm:$0xff] (!%p251_p9) }
  0x15   : > { %348 = vperm.xlu0 (!%p251_p9), %1163, %v338_v4   ;;  %v582_v45 = vld [vmem:[%s1567_s4 + $0x38] sm:$0xff] (!%p251_p9)  ;;  %v782_v47 = vld [vmem:[%s1568_s5 + $0x28] sm:$0xff] (!%p251_p9)  ;;  %v783_v48 = vld [vmem:[%s1568_s5 + $0x30] sm:$0xff] (!%p251_p9) }
  0x16   : > { %358 = vperm.xlu1 (!%p251_p9), %1164, %v340_v5   ;;  %v784_v51 = vld [vmem:[%s1568_s5 + $0x38] sm:$0xff] (!%p251_p9) }
  0x17   : > { %s292_s21 = scalar_select %p291_p10, %s1321_s14, 124  ;;  %v336_v6 = vld [vmem:[%s1564_s1 + $0x18] sm:$0xff] }
  0x19   : > { %s974_s6 = sshll.u32 %s292_s21, 3  ;;  %585 = vperm.xlu0 %1163, %v575_v7   ;;  %s1232_s21 = smov [#allocation3]  }
  0x1a   : > { %s1347_s10 = scalar_lea.vmem %s1563_s0, %s974_s6  ;;  %590 = vperm.xlu1 %1164, %v576_v8   ;;  %s283_s6 = sand.u32 1, %s1219_s27  }
  0x1b   : > { %v317_v9 = vld [vmem:[%s1347_s10 + $0x80] sm:$0xff]  ;;  %v318_v10 = vld [vmem:[%s1347_s10 + $0x88] sm:$0xff]  ;;  %v319_v14 = vld [vmem:[%s1347_s10 + $0x90] sm:$0xff]  ;;  %s972_s30 = sshll.u32 %s283_s6, 1  ;;  %s895_s19 = scalar_lea.sflag [#allocation4], %s283_s6 }
  0x1c   : > { %v301_v11 = vld [vmem:[%s1347_s10] sm:$0xff]  ;;  %v1065_v12 = vpack.c.bf16 %v318_v10, %v317_v9  ;;  %v302_v13 = vld [vmem:[%s1347_s10 + $0x8] sm:$0xff]  ;;  %v320_v15 = vld [vmem:[%s1347_s10 + $0x98] sm:$0xff]  ;;  %s285_s9 = scalar_lea.vmem [#allocation3], %s972_s30  ;;  %s1169_s22 = sshll.u32 %s1232_s21, 4  ;;  %s1170_s22 = int_to_ptr.vmem [resolvable:$false] %s1169_s22 }
  0x1d   : > { %v1068_v16 = vpack.c.bf16 %v302_v13, %v301_v11  ;;  %v1071_v17 = vpack.c.bf16 %v320_v15, %v319_v14  ;;  %v303_v19 = vld [vmem:[%s1347_s10 + $0x10] sm:$0xff]  ;;  %v304_v20 = vld [vmem:[%s1347_s10 + $0x18] sm:$0xff]  ;;  %v321_v22 = vld [vmem:[%s1347_s10 + $0xa0] sm:$0xff]  ;;  %595 = vperm.xlu0 %1163, %v577_v18   ;;  %s909_s15 = sshll.u32 %s285_s9, 4  ;;  %s1523_s15 = int_to_ptr.vmem [resolvable:$true] %s909_s15 }
  0x1e   : > { %1067 = vmatprep.subr.msk.bf16.mxu0 %vm1351_vm1, %v1065_v12  ;;  %v322_v23 = vld [vmem:[%s1347_s10 + $0xa8] sm:$0xff]  ;;  %v1074_v24 = vpack.c.bf16 %v304_v20, %v303_v19  ;;  %600 = vperm.xlu1 %1164, %v578_v21   ;;  %v305_v29 = vld [vmem:[%s1347_s10 + $0x20] sm:$0xff]  ;;  %v323_v32 = vld [vmem:[%s1347_s10 + $0xb0] sm:$0xff]  ;;  %s1165_s20 = scalar_lea.vmem %s1523_s15, 32  ;;  %p1172_p0 = scmp.lt.s32.totalorder %s1523_s15, %s1170_s22 }
  0x1f   : > { %1070 = vmatpush3.bf16.xpose.msk.msra.mxu0 %vm1351_vm1, %v1068_v16  ;;  %v1077_v26 = vpack.c.bf16 %v322_v23, %v321_v22  ;;  %v306_v30 = vld [vmem:[%s1347_s10 + $0x28] sm:$0xff]  ;;  %v324_v33 = vld [vmem:[%s1347_s10 + $0xb8] sm:$0xff]  ;;  %v307_v39 = vld [vmem:[%s1347_s10 + $0x30] sm:$0xff]  ;;  %p1166_p11 = scmp.ne.s32.totalorder %s1523_s15, %s1165_s20 }
  0x20   : > { %1073 = vmatprep.subr.msk.bf16.mxu0 %vm1351_vm1, %v1071_v17  ;;  %v1080_v34 = vpack.c.bf16 %v306_v30, %v305_v29  ;;  %v1083_v36 = vpack.c.bf16 %v324_v33, %v323_v32  ;;  %v308_v40 = vld [vmem:[%s1347_s10 + $0x38] sm:$0xff]  ;;  %v325_v42 = vld [vmem:[%s1347_s10 + $0xc0] sm:$0xff]  ;;  %v326_v43 = vld [vmem:[%s1347_s10 + $0xc8] sm:$0xff] }
  0x21   : > { %787 = vperm.xlu0 %1163, %v777_v25   ;;  %v1086_v44 = vpack.c.bf16 %v308_v40, %v307_v39  ;;  %v1089_v46 = vpack.c.bf16 %v326_v43, %v325_v42  ;;  %v309_v49 = vld [vmem:[%s1347_s10 + $0x40] sm:$0xff]  ;;  %v310_v50 = vld [vmem:[%s1347_s10 + $0x48] sm:$0xff]  ;;  %v327_v52 = vld [vmem:[%s1347_s10 + $0xd0] sm:$0xff]  ;;  %p1167_p12 = pnand %p1166_p11, %p1311_p5 }
  0x22   : > { %792 = vperm.xlu1 %1164, %v778_v27   ;;  %v328_v53 = vld [vmem:[%s1347_s10 + $0xd8] sm:$0xff]  ;;  %v1092_v54 = vpack.c.bf16 %v310_v50, %v309_v49  ;;  %v311_v56 = vld [vmem:[%s1347_s10 + $0x50] sm:$0xff]  ;;  %v329_v58 = vld [vmem:[%s1347_s10 + $0xe0] sm:$0xff] }
  0x23   : > { %v1095_v55 = vpack.c.bf16 %v328_v53, %v327_v52  ;;  %v312_v57 = vld [vmem:[%s1347_s10 + $0x58] sm:$0xff]  ;;  %v330_v59 = vld [vmem:[%s1347_s10 + $0xe8] sm:$0xff]  ;;  %v313_v62 = vld [vmem:[%s1347_s10 + $0x60] sm:$0xff]  ;;  %p1168_p13 = pneg %p1167_p12 }
  0x24   : > { %v1098_v60 = vpack.c.bf16 %v312_v57, %v311_v56  ;;  %v1101_v61 = vpack.c.bf16 %v330_v59, %v329_v58  ;;  %v314_v63 = vld [vmem:[%s1347_s10 + $0x68] sm:$0xff]  ;;  %v331_v1 = vld [vmem:[%s1347_s10 + $0xf0] sm:$0xff]  ;;  %v332_v2 = vld [vmem:[%s1347_s10 + $0xf8] sm:$0xff] }
  0x25   : > { %605 = vperm.xlu0 %1163, %v579_v28   ;;  %v1104_v3 = vpack.c.bf16 %v314_v63, %v313_v62  ;;  %v1107_v4 = vpack.c.bf16 %v332_v2, %v331_v1  ;;  %v315_v5 = vld [vmem:[%s1347_s10 + $0x70] sm:$0xff]  ;;  %v316_v7 = vld [vmem:[%s1347_s10 + $0x78] sm:$0xff]  ;;  %v334_v9 = vld [vmem:[%s1564_s1 + $0x8] sm:$0xff]  ;;  %s1171_s10 = scalar_lea.vmem %s1170_s22, 64 }
  0x26   : > { %797 = vperm.xlu1 %1164, %v779_v31   ;;  %v1110_v8 = vpack.c.bf16 %v316_v7, %v315_v5  ;;  %v335_v10 = vld [vmem:[%s1564_s1 + $0x10] sm:$0xff]  ;;  %v567_v43 = vld [vmem:[%s1566_s3] sm:$0xff]  ;;  %v574_v50 = vld [vmem:[%s1566_s3 + $0x38] sm:$0xff]  ;;  %p1173_p1 = scmp.lt.s32.totalorder %s1171_s10, %s1165_s20 }
  0x27   : > { %1076 = vmatpush3.bf16.xpose.msk.msra.mxu0 %vm1351_vm1, %v1074_v24  ;;  %v573_v49 = vld [vmem:[%s1566_s3 + $0x30] sm:$0xff] }
  0x28   : > { %1079 = vmatprep.subr.msk.bf16.mxu0 %vm1351_vm1, %v1077_v26  ;;  %p1174_p2 = por %p1173_p1, %p1172_p0 }
  0x29   : > { %610 = vperm.xlu0 %1163, %v580_v35  }
  0x2a   : > { %802 = vperm.xlu1 %1164, %v780_v37   ;;  %p1175_p3 = pnand %p1174_p2, %p1168_p13 }
  0x2d   : > { %615 = vperm.xlu0 %1163, %v581_v38  }
  0x2e   : > { %807 = vperm.xlu1 %1164, %v781_v41  }
  0x2f   : > { %1082 = vmatpush3.bf16.xpose.msk.msra.mxu0 %vm1351_vm1, %v1080_v34 }
  0x30   : > { %1085 = vmatprep.subr.msk.bf16.mxu0 %vm1351_vm1, %v1083_v36 }
  0x31   : > { %620 = vperm.xlu0 %1163, %v582_v45   ;;  %v569_v45 = vld [vmem:[%s1566_s3 + $0x10] sm:$0xff] }
  0x32   : > { %812 = vperm.xlu1 %1164, %v782_v47   ;;  %v571_v47 = vld [vmem:[%s1566_s3 + $0x20] sm:$0xff] }
  0x35   : > { %817 = vperm.xlu0 %1163, %v783_v48   ;;  %v572_v48 = vld [vmem:[%s1566_s3 + $0x28] sm:$0xff] }
  0x36   : > { %822 = vperm.xlu1 %1164, %v784_v51  }
  0x37   : > { %1088 = vmatpush3.bf16.xpose.msk.msra.mxu0 %vm1351_vm1, %v1086_v44  ;;  %v568_v44 = vld [vmem:[%s1566_s3 + $0x8] sm:$0xff] }
  0x38   : > { %1091 = vmatprep.subr.msk.bf16.mxu0 %vm1351_vm1, %v1089_v46  ;;  %v570_v46 = vld [vmem:[%s1566_s3 + $0x18] sm:$0xff] }
  0x3f   : > { %1094 = vmatpush3.bf16.xpose.msk.msra.mxu0 %vm1351_vm1, %v1092_v54 }
  0x40   : > { %1097 = vmatprep.subr.msk.bf16.mxu0 %vm1351_vm1, %v1095_v55 }
  0x47   : > { %1100 = vmatpush3.bf16.xpose.msk.msra.mxu0 %vm1351_vm1, %v1098_v60 }
  0x48   : > { %1103 = vmatprep.subr.msk.bf16.mxu0 %vm1351_vm1, %v1101_v61 }
  0x4f   : > { %1106 = vmatpush3.bf16.xpose.msk.msra.mxu0 %vm1351_vm1, %v1104_v3 }
  0x50   : > { %1109 = vmatprep.subr.msk.bf16.mxu0 %vm1351_vm1, %v1107_v4 }
  0x57   : > { %1112 = vmatpush3.bf16.xpose.msk.msra.mxu0 %vm1351_vm1, %v1110_v8 }
  0x5e   : > { %1058 = vmatmul.mubr.msk.f32.vlgmr.msra.gmra.mrb[0].mxu0 %vm361_vm0, %v1326_v0  ;;  %v1230_v0 = vmov 0.0  }
  0x5f   : > { %1059 = vmatprep.mubr.msk.f32.mxu0 %vm361_vm0, %v334_v9  ;;  %712 = vmatprep.mubr.f32.mxu1 %v1230_v0 }
  0x62   : > { %1060 = vmatmul.mubr.msk.f32.gmra.mrb[2].mxu0 %vm361_vm0, %v334_v9 }
  0x63   : > { %1061 = vmatprep.mubr.msk.f32.mxu0 %vm361_vm0, %v335_v10 }
  0x66   : > { %1062 = vmatmul.mubr.msk.f32.gmra.mrb[4].mxu0 %vm361_vm0, %v335_v10 }
  0x67   : > { %1063 = vmatprep.mubr.msk.f32.mxu0 %vm361_vm0, %v336_v6 }
  0x6a   : > { %1064 = vmatmul.mubr.msk.f32.gmra.mrb[6].mxu0 %vm361_vm0, %v336_v6 }
  0x90   : > { %v344_v11 = vpop.permute.xlu0 %343 }
  0x91   : > { %v354_v20 = vpop.permute.xlu1 %353 }
  0x94   : > { %v349_v15 = vpop.permute.xlu0 %348 }
  0x95   : > { %v359_v31 = vpop.permute.xlu1 %358 }
  0x98   : > { %v586_v51 = vpop.permute.xlu0 %585 }
  0x99   : > { %v591_v52 = vpop.permute.xlu1 %590 }
  0x9c   : > { %v596_v53 = vpop.permute.xlu0 %595 }
  0x9d   : > { %v601_v54 = vpop.permute.xlu1 %600 }
  0xa0   : > { %v788_v55 = vpop.permute.xlu0 %787 }
  0xa1   : > { %v793_v56 = vpop.permute.xlu1 %792 }
  0xa4   : > { %v606_v61 = vpop.permute.xlu0 %605 }
  0xa5   : > { %v798_v3 = vpop.permute.xlu1 %797 }
 0x131   : > { %v536_v12 = vpop.f32.mrb[0].mxu0 }
 0x132   : > { %v538_v13 = vpop.f32.mrb[1].mxu0  ;;  %v537_v14 = vadd.f32 %v536_v12, %v344_v11  ;;  %v611_v12 = vpop.permute.xlu0 %610 }
 0x133   : > { %v539_v16 = vadd.f32 %v538_v13, %v344_v11 }
 0x134   : > { %v559_v22 = vmax.f32 %v537_v14, 0.0 }
 0x135   : > { %v542_v17 = vpop.f32.mrb[2].mxu0  ;;  %v560_v24 = vmax.f32 %v539_v16, 0.0 }
 0x136   : > { %v543_v18 = vadd.f32 %v542_v17, %v349_v15  ;;  %v544_v19 = vpop.f32.mrb[3].mxu0 }
 0x137   : > { %v545_v21 = vadd.f32 %v544_v19, %v349_v15 }
 0x138   : > { %v561_v23 = vmax.f32 %v543_v18, 0.0  ;;  %v803_v18 = vpop.permute.xlu1 %802 }
 0x139   : > { %v562_v25 = vmax.f32 %v545_v21, 0.0  ;;  %v548_v26 = vpop.f32.mrb[4].mxu0 }
 0x13a   : > { %v550_v27 = vpop.f32.mrb[5].mxu0  ;;  %v1115_v28 = vpack.c.bf16 %v561_v23, %v559_v22  ;;  %v549_v30 = vadd.f32 %v548_v26, %v354_v20 }
 0x13b   : > { %v1113_v29 = vpack.c.bf16 %v562_v25, %v560_v24  ;;  %v551_v32 = vadd.f32 %v550_v27, %v354_v20 }
 0x13c   : > { %v563_v37 = vmax.f32 %v549_v30, 0.0 }
 0x13d   : > { %v554_v33 = vpop.f32.mrb[6].mxu0  ;;  %1114 = vmatprep.subr.bf16.mxu1 %v1113_v29  ;;  %v564_v39 = vmax.f32 %v551_v32, 0.0  ;;  %v616_v29 = vpop.permute.xlu0 %615 }
 0x13e   : > { %v555_v34 = vadd.f32 %v554_v33, %v359_v31  ;;  %v556_v35 = vpop.f32.mrb[7].mxu0  ;;  %1116 = vmatpush1.bf16.msra.mxu1 %v1115_v28 }
 0x13f   : > { %v557_v36 = vadd.f32 %v556_v35, %v359_v31 }
 0x140   : > { %v565_v38 = vmax.f32 %v555_v34, 0.0 }
 0x141   : > { %v566_v40 = vmax.f32 %v557_v36, 0.0  ;;  %v808_v36 = vpop.permute.xlu1 %807 }
 0x142   : > { %v1119_v41 = vpack.c.bf16 %v565_v38, %v563_v37 }
 0x143   : > { %v1117_v42 = vpack.c.bf16 %v566_v40, %v564_v39 }
 0x145   : > { %1118 = vmatprep.subr.bf16.mxu1 %v1117_v42 }
 0x146   : > { %1120 = vmatpush1.bf16.msra.mxu1 %v1119_v41 }
 0x149   : > { %1011 = vmatmul.mubr.msk.f32.vlgmr.msra.gmra.mrb[0].mxu1 %vm623_vm2, %v567_v43 }
 0x14a   : > { %718 = vmatprep.mubr.f32.mxu1 %v1230_v0 }
 0x14d   : > { %1012 = vmatmul.mubr.msk.f32.gmra.mrb[2].mxu1 %vm623_vm2, %v568_v44 }
 0x14e   : > { %724 = vmatprep.mubr.f32.mxu1 %v1230_v0 }
 0x151   : > { %1013 = vmatmul.mubr.msk.f32.gmra.mrb[4].mxu1 %vm623_vm2, %v569_v45 }
 0x152   : > { %730 = vmatprep.mubr.f32.mxu1 %v1230_v0 }
 0x155   : > { %1014 = vmatmul.mubr.msk.f32.gmra.mrb[6].mxu1 %vm623_vm2, %v570_v46 }
 0x156   : > { %736 = vmatprep.mubr.f32.mxu1 %v1230_v0 }
 0x159   : > { %1015 = vmatmul.mubr.msk.f32.gmra.mrb[8].mxu1 %vm623_vm2, %v571_v47  ;;  %v621_v47 = vpop.permute.xlu0 %620 }
 0x15a   : > { %742 = vmatprep.mubr.f32.mxu1 %v1230_v0 }
 0x15d   : > { %1016 = vmatmul.mubr.msk.f32.gmra.mrb[10].mxu1 %vm623_vm2, %v572_v48 }
 0x15e   : > { %748 = vmatprep.mubr.f32.mxu1 %v1230_v0 }
 0x161   : > { %1017 = vmatmul.mubr.msk.f32.gmra.mrb[12].mxu1 %vm623_vm2, %v573_v49 }
 0x162   : > { %754 = vmatprep.mubr.f32.mxu1 %v1230_v0 }
 0x165   : > { %1018 = vmatmul.mubr.msk.f32.gmra.mrb[14].mxu1 %vm623_vm2, %v574_v50 }
 0x21c   : > { %v714_v57 = vpop.f32.mrb[0].mxu1 }
 0x21d   : > { %v715_v58 = vadd.f32 %v714_v57, %v586_v51  ;;  %v716_v59 = vpop.f32.mrb[1].mxu1 }
 0x21e   : > { %v717_v60 = vadd.f32 %v716_v59, %v586_v51 }
 0x21f   : > { %v761_v63 = vmax.f32 %v715_v58, 0.0 }
 0x220   : > { %v720_v62 = vpop.f32.mrb[2].mxu1  ;;  %v762_v4 = vmax.f32 %v717_v60, 0.0 }
 0x221   : > { %v721_v1 = vadd.f32 %v720_v62, %v591_v52  ;;  %v722_v2 = vpop.f32.mrb[3].mxu1  ;;  %v825_v10 = vmul.f32 %v788_v55, %v761_v63  ;;  %v818_v63 = vpop.permute.xlu0 %817 }
 0x222   : > { %v723_v5 = vadd.f32 %v722_v2, %v591_v52  ;;  %v826_v13 = vmul.f32 %v788_v55, %v762_v4  ;;  %v813_v52 = vpop.permute.xlu1 %812 }
 0x223   : > { %v763_v7 = vmax.f32 %v721_v1, 0.0 }
 0x224   : > { %v764_v8 = vmax.f32 %v723_v5, 0.0  ;;  %v726_v9 = vpop.f32.mrb[4].mxu1 }
 0x225   : > { %v827_v6 = vmul.f32 %v793_v56, %v763_v7  ;;  %v727_v0 = vadd.f32 %v726_v9, %v596_v53  ;;  %v728_v11 = vpop.f32.mrb[5].mxu1 }
 0x226   : > { %v828_v14 = vmul.f32 %v793_v56, %v764_v8  ;;  %v729_v15 = vadd.f32 %v728_v11, %v596_v53 }
 0x227   : > { %v841_v16 = vadd.f32 %v827_v6, %v825_v10  ;;  %v765_v17 = vmax.f32 %v727_v0, 0.0  ;;  %v823_v0 = vpop.permute.xlu1 %822 }
 0x228   : > { %v854_v19 = vadd.f32 %v828_v14, %v826_v13  ;;  %v766_v20 = vmax.f32 %v729_v15, 0.0  ;;  %v732_v21 = vpop.f32.mrb[6].mxu1 }
 0x229   : > { %v829_v22 = vmul.f32 %v798_v3, %v765_v17  ;;  %v733_v23 = vadd.f32 %v732_v21, %v601_v54  ;;  %v734_v24 = vpop.f32.mrb[7].mxu1 }
 0x22a   : > { %v830_v25 = vmul.f32 %v798_v3, %v766_v20  ;;  %v735_v26 = vadd.f32 %v734_v24, %v601_v54 }
 0x22b   : > { %v842_v27 = vadd.f32 %v841_v16, %v829_v22  ;;  %v767_v28 = vmax.f32 %v733_v23, 0.0  ;;  %v1231_v23 = vmov 1966171168  }
 0x22c   : > { %v855_v30 = vadd.f32 %v854_v19, %v830_v25  ;;  %v768_v31 = vmax.f32 %v735_v26, 0.0  ;;  %v738_v32 = vpop.f32.mrb[8].mxu1  ;;  %v875_v24 = vunpack.c.l.s4 %v1231_v23  ;;  %v877_v25 = vlaneseq }
 0x22d   : > { %v831_v33 = vmul.f32 %v803_v18, %v767_v28  ;;  %v739_v34 = vadd.f32 %v738_v32, %v606_v61  ;;  %v740_v35 = vpop.f32.mrb[9].mxu1 }
 0x22e   : > { %v832_v37 = vmul.f32 %v803_v18, %v768_v31  ;;  %v741_v38 = vadd.f32 %v740_v35, %v606_v61  ;;  %v876_v31 = vunpack.c.0.s8 %v875_v24  ;;  %v878_v32 = vshrl.u32 %v877_v25, 7 }
 0x22f   : > { %v843_v39 = vadd.f32 %v842_v27, %v831_v33  ;;  %v769_v40 = vmax.f32 %v739_v34, 0.0  ;;  %vm891_vm3 = vcmp.lt.s32.totalorder %v877_v25, 256 }
 0x230   : > { %v856_v41 = vadd.f32 %v855_v30, %v832_v37  ;;  %v770_v42 = vmax.f32 %v741_v38, 0.0  ;;  %v744_v43 = vpop.f32.mrb[10].mxu1  ;;  %v879_v37 = vsub.s32 %v876_v31, %v878_v32 }
 0x231   : > { %v833_v44 = vmul.f32 %v808_v36, %v769_v40  ;;  %v745_v45 = vadd.f32 %v744_v43, %v611_v12  ;;  %v746_v46 = vpop.f32.mrb[11].mxu1 }
 0x232   : > { %v834_v48 = vmul.f32 %v808_v36, %v770_v42  ;;  %v747_v49 = vadd.f32 %v746_v46, %v611_v12 }
 0x233   : > { %v844_v50 = vadd.f32 %v843_v39, %v833_v44  ;;  %v771_v51 = vmax.f32 %v745_v45, 0.0 }
 0x234   : > { %v857_v53 = vadd.f32 %v856_v41, %v834_v48  ;;  %v772_v54 = vmax.f32 %v747_v49, 0.0  ;;  %v750_v55 = vpop.f32.mrb[12].mxu1 }
 0x235   : > { %v835_v56 = vmul.f32 %v813_v52, %v771_v51  ;;  %v751_v57 = vadd.f32 %v750_v55, %v616_v29  ;;  %v752_v58 = vpop.f32.mrb[13].mxu1 }
 0x236   : > { %v836_v59 = vmul.f32 %v813_v52, %v772_v54  ;;  %v753_v60 = vadd.f32 %v752_v58, %v616_v29  ;;  %v868_v29 = vstv %s867_s25 }
 0x237   : > { %v845_v61 = vadd.f32 %v844_v50, %v835_v56  ;;  %v773_v62 = vmax.f32 %v751_v57, 0.0 }
 0x238   : > { %v858_v1 = vadd.f32 %v857_v53, %v836_v59  ;;  %v774_v2 = vmax.f32 %v753_v60, 0.0  ;;  %v756_v3 = vpop.f32.mrb[14].mxu1 }
 0x239   : > { %v837_v4 = vmul.f32 %v818_v63, %v773_v62  ;;  %v757_v5 = vadd.f32 %v756_v3, %v621_v47  ;;  %v758_v7 = vpop.f32.mrb[15].mxu1 }
 0x23a   : > { %v838_v8 = vmul.f32 %v818_v63, %v774_v2  ;;  %v759_v9 = vadd.f32 %v758_v7, %v621_v47 }
 0x23b   : > { %v846_v10 = vadd.f32 %v845_v61, %v837_v4  ;;  %v775_v6 = vmax.f32 %v757_v5, 0.0 }
 0x23c   : > { %v859_v11 = vadd.f32 %v858_v1, %v838_v8  ;;  %v776_v12 = vmax.f32 %v759_v9, 0.0 }
 0x23d   : > { %v839_v13 = vmul.f32 %v823_v0, %v775_v6 }
 0x23e   : > { %v840_v14 = vmul.f32 %v823_v0, %v776_v12 }
 0x23f   : > { %v847_v15 = vadd.f32 %v846_v10, %v839_v13 }
 0x240   : > { %v860_v16 = vadd.f32 %v859_v11, %v840_v14 }
 0x241   : > { %v848_v17 = vrot.slane %v847_v15, 4 }
 0x242   : > { %v861_v18 = vrot.slane %v860_v16, 4 }
 0x243   : > { %v849_v19 = vadd.f32 %v848_v17, %v847_v15 }
 0x244   : > { %v862_v20 = vadd.f32 %v861_v18, %v860_v16 }
 0x245   : > { %v850_v21 = vrot.slane %v849_v19, 2 }
 0x246   : > { %v863_v22 = vrot.slane %v862_v20, 2 }
 0x247   : > { %v851_v26 = vadd.f32 %v850_v21, %v849_v19 }
 0x248   : > { %v864_v27 = vadd.f32 %v863_v22, %v862_v20 }
 0x249   : > { %v852_v28 = vrot.slane %v851_v26, 1 }
 0x24a   : > { %v865_v30 = vrot.slane %v864_v27, 1 }
 0x24b   : > { %v853_v33 = vadd.f32 %v852_v28, %v851_v26 }
 0x24c   : > { %v866_v34 = vadd.f32 %v865_v30, %v864_v27 }
 0x24d   : > { %v869_v35 = vadd.f32 %v868_v29, %v853_v33 }
 0x24e   : > { %v870_v36 = vadd.f32 %v868_v29, %v866_v34 }
 0x250   : > { %v873_v38 = vcombine.low %v869_v35, %v870_v36 }
 0x252   : > { %v880_v39 = vrot.slane %v873_v38, %v879_v37 }
 0x254   : > { %v887_v40 = vrot.slane %v880_v39, %v879_v37 }
 0x256   : > { %893 = vst.msk [vmem:[%s285_s9] sm:$0x3] %vm891_vm3, %v887_v40 }
 0x257   : > { %1178 = shalt.err (!%p1175_p3)
}
 0x258   : > { %s1179_s14 = scalar_lea.hbm %s1521_s18, 32  ;;  %s1183_s25 = scalar_lea.hbm %s1570_s7, 128 }
 0x259   : > { %p1180_p4 = scmp.ne.s32.totalorder %s1521_s18, %s1179_s14  ;;  %p1184_p9 = scmp.lt.u32.totalorder %s1521_s18, %s1570_s7 }
 0x25a   : > { %p1185_p10 = scmp.lt.u32.totalorder %s1183_s25, %s1179_s14  ;;  %p1187_p12 = scmp.lt.u32.totalorder %s1179_s14, %s1521_s18 }
 0x25b   : > { %p1181_p7 = pnand %p1180_p4, %p1311_p5 }
 0x25c   : > { %p1186_p11 = por %p1185_p10, %p1184_p9 }
 0x25d   : > { %p1182_p8 = pneg %p1181_p7 }
 0x25e   : > { %p1188_p13 = por %p1187_p12, %p1186_p11 }
 0x260   : > { %p1189_p0 = pnand %p1188_p13, %p1182_p8 }
 0x262   : > { %1192 = shalt.err (!%p1189_p0)
}
 0x263   : > { %1121 = dma.vmem_to_hbm [thread:$0]  (%p1311_p5), %s1523_s15, 32, %s1521_s18, %s895_s19  }
 0x264 PF: > { %p1127_p1 = scmp.ge.s32.totalorder %s1227_s29, 2  ;;  %s921_s9 = sand.u32 1, %s1215_s26  }
 0x265   : > { %s922_s16 = scalar_lea.sflag [#allocation4], %s921_s9 }
 0x266   : > { %p1124_p2 = pnand %p1127_p1, %p1315_p6 }
 0x268   : > { %1210 = dma.done.wait (!%p1124_p2), %s922_s16, 32  }
 0x269   : > { %1212 = vsyncadd (!%p1124_p2), %s922_s16, 4294967264  ;;  %p18_p3 = scmp.ge.s32.totalorder %s1299_s8, 6   ;;  %s1575_s26 = smov %s1219_s27 }
 0x26a   : > { %s1576_s27 = smov %s1223_s28  ;;  %s1577_s28 = smov %s1309_s11 }
 0x26b   : > { %s1578_s29 = smov %s1299_s8  ;;  %20 = sbr.rel (!%p18_p3) target bundleno = 5 (0x5), region = 83 }
 0x272   :  { %927 = vsyncpa [#allocation4], 1 }
 0x273   :  { %929 = vsyncpa [#allocation4 + $0x1], 1 }

</bundles_post_ra>
